<compile_context>
chip_gen: v7x
topology: tpu7x:2x2x1
jax: 0.10.0
libtpu: 0.0.40
codegen_flags: <defaults>
</compile_context>

<pallas_src>
import jax
import jax.numpy as jnp
from jax.experimental import pallas as pl
from jax.experimental.pallas import tpu as pltpu


# ---------------------------------------------------------------------------
# Kernels
# ---------------------------------------------------------------------------

def _vq_kernel_with_d(latent_ref, embt_ref, emb_sq_ref, d_ref, idx_ref,
                      latsq_sc, min_sc, arg_sc):
    """One (row-tile i, code-chunk j) step; emits distances + running argmin."""
    j = pl.program_id(1)

    @pl.when(j == 0)
    def _():
        # ||z||^2 hoisted out of the code-chunk loop: computed once per row
        # tile into VMEM scratch and reused for every chunk.
        latsq_sc[...] = jnp.sum(
            jnp.square(latent_ref[...].astype(jnp.float32)),
            axis=1, keepdims=True)
        min_sc[...] = jnp.full(min_sc.shape, jnp.inf, dtype=min_sc.dtype)
        arg_sc[...] = jnp.zeros(arg_sc.shape, dtype=arg_sc.dtype)

    # z @ e^T with a pre-transposed codebook: standard (M,K)x(K,N) contraction
    # on the MXU, native-dtype operands, f32 accumulation.
    cross = jnp.dot(latent_ref[...], embt_ref[...],
                    preferred_element_type=jnp.float32)             # (tn, tc)

    d = latsq_sc[...] + emb_sq_ref[...] - 2.0 * cross               # f32
    d_ref[...] = d.astype(d_ref.dtype)

    # Per-row argmin within this chunk (first occurrence on ties).
    tc = d.shape[1]
    tile_min = jnp.min(d, axis=-1, keepdims=True)                   # (tn, 1)
    code_iota = jax.lax.broadcasted_iota(jnp.int32, d.shape, 1)
    tile_arg = jnp.min(
        jnp.where(d == tile_min, code_iota, jnp.int32(2 ** 30)),
        axis=-1, keepdims=True) + j * tc                            # (tn, 1)

    # Running min across chunks (strict <: earlier chunks win ties).
    better = tile_min < min_sc[...]
    arg_sc[...] = jnp.where(better, tile_arg, arg_sc[...])
    min_sc[...] = jnp.where(better, tile_min, min_sc[...])

    @pl.when(j == pl.num_programs(1) - 1)
    def _():
        idx_ref[...] = arg_sc[...]


def _vq_kernel_no_d(latent_ref, embt_ref, emb_sqh_ref, idx_ref,
                    min_sc, arg_sc):
    """Argmin-only variant: the (N, n_e) distance matrix is never written.

    argmin_k ||z - e_k||^2 == argmin_k (0.5*||e_k||^2 - z . e_k), so ||z||^2
    and the *2 / add epilogue are dropped entirely.
    """
    j = pl.program_id(1)

    @pl.when(j == 0)
    def _():
        min_sc[...] = jnp.full(min_sc.shape, jnp.inf, dtype=min_sc.dtype)
        arg_sc[...] = jnp.zeros(arg_sc.shape, dtype=arg_sc.dtype)

    cross = jnp.dot(latent_ref[...], embt_ref[...],
                    preferred_element_type=jnp.float32)             # (tn, tc)
    score = emb_sqh_ref[...] - cross                                # f32

    tc = score.shape[1]
    tile_min = jnp.min(score, axis=-1, keepdims=True)
    code_iota = jax.lax.broadcasted_iota(jnp.int32, score.shape, 1)
    tile_arg = jnp.min(
        jnp.where(score == tile_min, code_iota, jnp.int32(2 ** 30)),
        axis=-1, keepdims=True) + j * tc

    better = tile_min < min_sc[...]
    arg_sc[...] = jnp.where(better, tile_arg, arg_sc[...])
    min_sc[...] = jnp.where(better, tile_min, min_sc[...])

    @pl.when(j == pl.num_programs(1) - 1)
    def _():
        idx_ref[...] = arg_sc[...]


# ---------------------------------------------------------------------------
# Wrapper
# ---------------------------------------------------------------------------

def _round_up(v, m):
    return -(-v // m) * m


def _vmem_capacity_bytes():
    try:
        cap = getattr(pltpu.get_tpu_info(), "vmem_capacity_bytes", None)
        if cap:
            return int(cap)
    except Exception:
        pass
    return 64 * 2 ** 20          # conservative default: v7x per-TC VMEM


def _pick_row_tile(n, row_tile):
    """Row tile: multiple of 8, divides n when possible (no pad / no slice
    copy of d), and leaves >= 2 grid steps so the 'parallel' axis spans both
    v7x TensorCores."""
    if n % 8 == 0:
        divs = [t for t in range(8, min(n, row_tile) + 1, 8) if n % t == 0]
        if divs:
            multi = [t for t in divs if n // t >= 2]
            tn = max(multi) if multi else max(divs)
            return tn, n
    n8 = _round_up(max(n, 8), 8)
    if 8 < n8 <= row_tile:
        tn = _round_up(n8 // 2, 8)          # ~half => >= 2 grid steps
    else:
        tn = min(row_tile, n8)
    return tn, _round_up(n, tn)


def _pick_code_tile(n_e, code_tile):
    """Code chunk: multiple of 128; prefer one that divides n_e (no pad)."""
    tc = min(code_tile, _round_up(n_e, 128))
    tc = max(128, (tc // 128) * 128)
    if n_e % 128 == 0:
        for cand in range(tc, 0, -128):
            if n_e % cand == 0:
                return cand, n_e
    return tc, _round_up(n_e, tc)


def vector_quantizer_forward(x, embedding, beta=0.25, *,
                             return_d=True, d_dtype=None, matmul_dtype=None,
                             row_tile=512, code_tile=1024):
    """Pallas implementation of VectorQuantizer.forward(x, use_sk=False).

    Returns (x_q, loss, indices, d).  d is None when return_d=False (most VQ
    training loops only need x_q / indices; dropping d removes the dominant
    HBM writeback).  d_dtype=jnp.bfloat16 halves d write traffic if d is kept.
    """
    orig_shape = x.shape
    n_e, e_dim = embedding.shape
    latent = x.reshape(-1, e_dim)
    n = latent.shape[0]

    if d_dtype is None:
        d_dtype = x.dtype           # matches the PyTorch forward's dtype
    if matmul_dtype is None:
        # bf16 operands only when the exact d matrix is not emitted (argmin
        # is insensitive to the rounding; 2-4x MXU throughput for f32 inputs
        # and half the operand DMA bytes).
        matmul_dtype = (jnp.bfloat16
                        if (not return_d and x.dtype == jnp.float32)
                        else x.dtype)
    op_bytes = jnp.dtype(matmul_dtype).itemsize
    d_bytes = jnp.dtype(d_dtype).itemsize if return_d else 0

    # ---- tiling -----------------------------------------------------------
    tn, n_p = _pick_row_tile(n, row_tile)

    vmem_budget = int(0.75 * _vmem_capacity_bytes())     # headroom vs physical

    def est(tc_):
        # double-buffered pipeline tiles + scratch
        return (2 * (tn * e_dim * op_bytes + e_dim * tc_ * op_bytes
                     + tc_ * 4 + tn * tc_ * d_bytes + tn * 4)
                + 3 * tn * 4)

    if est(n_e) <= vmem_budget:
        # Whole codebook per step: no n_e padding / sentinel / slice, and the
        # codebook block index is constant so it is DMA'd into VMEM only once.
        tc, n_e_p = n_e, n_e
    else:
        tc, n_e_p = _pick_code_tile(n_e, code_tile)

    grid = (n_p // tn, n_e_p // tc)
    vmem_limit = int(min(vmem_budget, max(32 * 2 ** 20, 2 * est(tc))))

    # ---- operands ----------------------------------------------------------
    latent_k = latent.astype(matmul_dtype)
    if n_p != n:
        latent_k = jnp.pad(latent_k, ((0, n_p - n), (0, 0)))

    # Codebook pre-transposed to (e_dim, n_e_p): no per-step transpose in the
    # kernel.  ||e||^2 hoisted to the wrapper (f32, from the f32 codebook).
    emb_t = embedding.astype(matmul_dtype).T
    emb_sq = jnp.sum(jnp.square(embedding.astype(jnp.float32)), axis=1)
    if n_e_p != n_e:
        emb_t = jnp.pad(emb_t, ((0, 0), (0, n_e_p - n_e)))
        emb_sq = jnp.pad(emb_sq, (0, n_e_p - n_e), constant_values=1e30)
    emb_sq = emb_sq.reshape(1, n_e_p)

    in_specs = [
        pl.BlockSpec((tn, e_dim), lambda i, j: (i, 0)),      # latent rows
        pl.BlockSpec((e_dim, tc), lambda i, j: (0, j)),      # codebook chunk
        pl.BlockSpec((1, tc), lambda i, j: (0, j)),          # ||e||^2 chunk
    ]
    idx_spec = pl.BlockSpec((tn, 1), lambda i, j: (i, 0))
    compiler_params = pltpu.CompilerParams(
        dimension_semantics=("parallel", "arbitrary"),
        vmem_limit_bytes=vmem_limit)

    if return_d:
        d_p, idx_p = pl.pallas_call(
            _vq_kernel_with_d,
            out_shape=(jax.ShapeDtypeStruct((n_p, n_e_p), d_dtype),
                       jax.ShapeDtypeStruct((n_p, 1), jnp.int32)),
            grid=grid,
            in_specs=in_specs,
            out_specs=(pl.BlockSpec((tn, tc), lambda i, j: (i, j)), idx_spec),
            scratch_shapes=[pltpu.VMEM((tn, 1), jnp.float32),   # ||z||^2
                            pltpu.VMEM((tn, 1), jnp.float32),   # running min
                            pltpu.VMEM((tn, 1), jnp.int32)],    # running arg
            compiler_params=compiler_params,
        )(latent_k, emb_t, emb_sq)
        d = d_p if (n_p == n and n_e_p == n_e) else d_p[:n, :n_e]
    else:
        idx_p = pl.pallas_call(
            _vq_kernel_no_d,
            out_shape=jax.ShapeDtypeStruct((n_p, 1), jnp.int32),
            grid=grid,
            in_specs=in_specs,
            out_specs=idx_spec,
            scratch_shapes=[pltpu.VMEM((tn, 1), jnp.float32),   # running min
                            pltpu.VMEM((tn, 1), jnp.int32)],    # running arg
            compiler_params=compiler_params,
        )(latent_k, emb_t, 0.5 * emb_sq)
        d = None

    indices_flat = idx_p[:n, 0]

    # Codebook gather (self.embedding(indices)), losses and straight-through
    # estimator are cheap (N, e_dim)-sized plain-JAX glue.
    x_q_flat = jnp.take(embedding, indices_flat, axis=0).astype(x.dtype)
    x_q = x_q_flat.reshape(orig_shape)

    mse = jnp.mean(jnp.square(x_q_flat.astype(jnp.float32)
                              - latent.astype(jnp.float32)))
    commitment_loss = mse          # F.mse_loss(x_q.detach(), x)  (fwd value)
    codebook_loss = mse            # F.mse_loss(x_q, x.detach())  (fwd value)
    loss = (codebook_loss + beta * commitment_loss).astype(x.dtype)

    # Straight-through estimator: x + (x_q - x).detach()
    x_q = x + jax.lax.stop_gradient(x_q - x)

    indices = indices_flat.reshape(orig_shape[:-1])
    return x_q, loss, indices, d


if __name__ == "__main__":
    key = jax.random.PRNGKey(0)
    B, T, e_dim, n_e = 2, 8, 32, 64
    k_x, k_emb = jax.random.split(key)

    x = jax.random.normal(k_x, (B, T, e_dim), dtype=jnp.float32)
    # nn.Embedding weight init: uniform_(-1/n_e, 1/n_e)
    embedding = jax.random.uniform(
        k_emb, (n_e, e_dim), dtype=jnp.float32,
        minval=-1.0 / n_e, maxval=1.0 / n_e)

    # Full path (returns d, matching the PyTorch forward signature).
    x_q, loss, indices, d = vector_quantizer_forward(x, embedding, beta=0.25)
    jax.block_until_ready((x_q, loss, indices, d))

    # Plain-JAX reference (same expansion as the PyTorch module).
    lat = x.reshape(-1, e_dim)
    d_ref = (jnp.sum(lat ** 2, axis=1, keepdims=True)
             + jnp.sum(embedding ** 2, axis=1, keepdims=True).T
             - 2.0 * lat @ embedding.T)
    idx_ref = jnp.argmin(d_ref, axis=-1).astype(jnp.int32)
    xq_ref = embedding[idx_ref].reshape(x.shape)
    mse_ref = jnp.mean((xq_ref - x) ** 2)
    loss_ref = mse_ref + 0.25 * mse_ref

    assert x_q.shape == (B, T, e_dim)
    assert indices.shape == (B, T)
    assert d.shape == (B * T, n_e)
    assert loss.shape == ()
    assert jnp.allclose(d, d_ref, rtol=1e-5, atol=1e-5)
    assert jnp.array_equal(indices.reshape(-1), idx_ref)
    assert jnp.allclose(x_q, xq_ref, rtol=1e-5, atol=1e-5)
    assert jnp.allclose(loss, loss_ref, rtol=1e-5, atol=1e-5)

    # Fast path (no distance matrix, bf16 matmul operands): check the chosen
    # codes are (numerically) nearest without requiring exact tie agreement.
    x_q2, loss2, indices2, d2 = vector_quantizer_forward(
        x, embedding, beta=0.25, return_d=False)
    jax.block_until_ready((x_q2, loss2, indices2))
    assert d2 is None
    assert indices2.shape == (B, T)
    assert x_q2.shape == (B, T, e_dim)
    chosen_d = jnp.take_along_axis(
        d_ref, indices2.reshape(-1, 1).astype(jnp.int32), axis=1)[:, 0]
    assert jnp.all(chosen_d <= jnp.min(d_ref, axis=-1) + 5e-2)

    print("KERNEL_OK")
</pallas_src>

<mosaic_0001>
module attributes {stable_mosaic.version = 11 : i64} {
  func.func @_vq_kernel_with_d(%arg0: i32, %arg1: i32, %arg2: memref<8x32xf32, #tpu.memory_space<vmem>>, %arg3: memref<32x64xf32, #tpu.memory_space<vmem>>, %arg4: memref<1x64xf32, #tpu.memory_space<vmem>>, %arg5: memref<8x64xf32, #tpu.memory_space<vmem>>, %arg6: memref<8x1xi32, #tpu.memory_space<vmem>>, %arg7: memref<8x1xf32, #tpu.memory_space<vmem>>, %arg8: memref<8x1xf32, #tpu.memory_space<vmem>>, %arg9: memref<8x1xi32, #tpu.memory_space<vmem>>) attributes {dimension_semantics = [#tpu.dimension_semantics<parallel>, #tpu.dimension_semantics<arbitrary>], iteration_bounds = array<i64: 2, 1>, scalar_prefetch = 0 : i64, scratch_operands = 3 : i64, tpu.core_type = #tpu.core_type<tc>, window_params = [{transform_indices = @transform_0, window_bounds = array<i64: 8, 32>}, {transform_indices = @transform_1, window_bounds = array<i64: 32, 64>}, {transform_indices = @transform_2, window_bounds = array<i64: 1, 64>}, {transform_indices = @transform_3, window_bounds = array<i64: 8, 64>}, {transform_indices = @transform_4, window_bounds = array<i64: 8, 1>}]} {
    %c0_i32 = arith.constant 0 : i32
    %0 = arith.cmpi eq, %arg1, %c0_i32 : i32
    %1 = arith.extui %0 : i1 to i32
    %c0_i32_0 = arith.constant 0 : i32
    %2 = arith.cmpi ne, %1, %c0_i32_0 : i32
    scf.if %2 {
      %c0_25 = arith.constant 0 : index
      %c0_26 = arith.constant 0 : index
      %38 = vector.load %arg2[%c0_25, %c0_26] : memref<8x32xf32, #tpu.memory_space<vmem>>, vector<8x32xf32>
      %39 = arith.mulf %38, %38 : vector<8x32xf32>
      %cst_27 = arith.constant dense<0.000000e+00> : vector<8xf32>
      %40 = vector.multi_reduction <add>, %39, %cst_27 [1] : vector<8x32xf32> to vector<8xf32>
      %41 = vector.shape_cast %40 : vector<8xf32> to vector<8x1xf32>
      %c0_28 = arith.constant 0 : index
      %c0_29 = arith.constant 0 : index
      %42 = vector.load %arg7[%c0_28, %c0_29] : memref<8x1xf32, #tpu.memory_space<vmem>>, vector<8x1xf32>
      tpu.vector_store %arg7[%c0_28, %c0_29], %41 {strides = array<i32>} : memref<8x1xf32, #tpu.memory_space<vmem>>, vector<8x1xf32>,
      %cst_30 = arith.constant 0x7F800000 : f32
      %43 = vector.broadcast %cst_30 : f32 to vector<8x1xf32>
      %c0_31 = arith.constant 0 : index
      %c0_32 = arith.constant 0 : index
      %44 = vector.load %arg8[%c0_31, %c0_32] : memref<8x1xf32, #tpu.memory_space<vmem>>, vector<8x1xf32>
      tpu.vector_store %arg8[%c0_31, %c0_32], %43 {strides = array<i32>} : memref<8x1xf32, #tpu.memory_space<vmem>>, vector<8x1xf32>,
      %c0_i32_33 = arith.constant 0 : i32
      %45 = vector.broadcast %c0_i32_33 : i32 to vector<8x1xi32>
      %c0_34 = arith.constant 0 : index
      %c0_35 = arith.constant 0 : index
      %46 = vector.load %arg9[%c0_34, %c0_35] : memref<8x1xi32, #tpu.memory_space<vmem>>, vector<8x1xi32>
      tpu.vector_store %arg9[%c0_34, %c0_35], %45 {strides = array<i32>} : memref<8x1xi32, #tpu.memory_space<vmem>>, vector<8x1xi32>,
    } else {
    }
    %c0 = arith.constant 0 : index
    %c0_1 = arith.constant 0 : index
    %3 = vector.load %arg2[%c0, %c0_1] : memref<8x32xf32, #tpu.memory_space<vmem>>, vector<8x32xf32>
    %c0_2 = arith.constant 0 : index
    %c0_3 = arith.constant 0 : index
    %4 = vector.load %arg3[%c0_2, %c0_3] : memref<32x64xf32, #tpu.memory_space<vmem>>, vector<32x64xf32>
    %cst = arith.constant dense<0.000000e+00> : vector<8x64xf32>
    %5 = tpu.matmul %3, %4, %cst {dimension_numbers = #tpu.dot_dimension_numbers<[1], [0], [0], [1], [0, 0, 1, 1], [], []>} : vector<8x32xf32>, vector<32x64xf32>, vector<8x64xf32> -> vector<8x64xf32>
    %c0_4 = arith.constant 0 : index
    %c0_5 = arith.constant 0 : index
    %6 = vector.load %arg7[%c0_4, %c0_5] : memref<8x1xf32, #tpu.memory_space<vmem>>, vector<8x1xf32>
    %c0_6 = arith.constant 0 : index
    %c0_7 = arith.constant 0 : index
    %7 = vector.load %arg4[%c0_6, %c0_7] : memref<1x64xf32, #tpu.memory_space<vmem>>, vector<1x64xf32>
    %8 = vector.broadcast %6 : vector<8x1xf32> to vector<8x64xf32>
    %9 = vector.broadcast %7 : vector<1x64xf32> to vector<8x64xf32>
    %10 = arith.addf %8, %9 : vector<8x64xf32>
    %cst_8 = arith.constant 2.000000e+00 : f32
    %11 = vector.broadcast %cst_8 : f32 to vector<8x64xf32>
    %12 = arith.mulf %11, %5 : vector<8x64xf32>
    %13 = arith.subf %10, %12 : vector<8x64xf32>
    %c0_9 = arith.constant 0 : index
    %c0_10 = arith.constant 0 : index
    %14 = vector.load %arg5[%c0_9, %c0_10] : memref<8x64xf32, #tpu.memory_space<vmem>>, vector<8x64xf32>
    tpu.vector_store %arg5[%c0_9, %c0_10], %13 {strides = array<i32>} : memref<8x64xf32, #tpu.memory_space<vmem>>, vector<8x64xf32>,
    %cst_11 = arith.constant dense<0x7F800000> : vector<8xf32>
    %15 = vector.multi_reduction <minimumf>, %13, %cst_11 [1] : vector<8x64xf32> to vector<8xf32>
    %16 = vector.shape_cast %15 : vector<8xf32> to vector<8x1xf32>
    %17 = tpu.iota {dimensions = array<i32: 1>} : vector<8x64xi32>
    %18 = vector.broadcast %16 : vector<8x1xf32> to vector<8x64xf32>
    %19 = arith.cmpf oeq, %13, %18 : vector<8x64xf32>
    %c1073741824_i32 = arith.constant 1073741824 : i32
    %20 = vector.broadcast %c1073741824_i32 : i32 to vector<8x64xi32>
    %21 = arith.select %19, %17, %20 : vector<8x64xi1>, vector<8x64xi32>
    %cst_12 = arith.constant dense<2147483647> : vector<8xi32>
    %22 = vector.multi_reduction <minsi>, %21, %cst_12 [1] : vector<8x64xi32> to vector<8xi32>
    %23 = vector.shape_cast %22 : vector<8xi32> to vector<8x1xi32>
    %c64_i32 = arith.constant 64 : i32
    %24 = arith.muli %arg1, %c64_i32 : i32
    %25 = vector.broadcast %24 : i32 to vector<8x1xi32>
    %26 = arith.addi %23, %25 : vector<8x1xi32>
    %c0_13 = arith.constant 0 : index
    %c0_14 = arith.constant 0 : index
    %27 = vector.load %arg8[%c0_13, %c0_14] : memref<8x1xf32, #tpu.memory_space<vmem>>, vector<8x1xf32>
    %28 = arith.cmpf olt, %16, %27 : vector<8x1xf32>
    %c0_15 = arith.constant 0 : index
    %c0_16 = arith.constant 0 : index
    %29 = vector.load %arg9[%c0_15, %c0_16] : memref<8x1xi32, #tpu.memory_space<vmem>>, vector<8x1xi32>
    %30 = arith.select %28, %26, %29 : vector<8x1xi1>, vector<8x1xi32>
    %c0_17 = arith.constant 0 : index
    %c0_18 = arith.constant 0 : index
    %31 = vector.load %arg9[%c0_17, %c0_18] : memref<8x1xi32, #tpu.memory_space<vmem>>, vector<8x1xi32>
    tpu.vector_store %arg9[%c0_17, %c0_18], %30 {strides = array<i32>} : memref<8x1xi32, #tpu.memory_space<vmem>>, vector<8x1xi32>,
    %c0_19 = arith.constant 0 : index
    %c0_20 = arith.constant 0 : index
    %32 = vector.load %arg8[%c0_19, %c0_20] : memref<8x1xf32, #tpu.memory_space<vmem>>, vector<8x1xf32>
    %33 = arith.select %28, %16, %32 : vector<8x1xi1>, vector<8x1xf32>
    %c0_21 = arith.constant 0 : index
    %c0_22 = arith.constant 0 : index
    %34 = vector.load %arg8[%c0_21, %c0_22] : memref<8x1xf32, #tpu.memory_space<vmem>>, vector<8x1xf32>
    tpu.vector_store %arg8[%c0_21, %c0_22], %33 {strides = array<i32>} : memref<8x1xf32, #tpu.memory_space<vmem>>, vector<8x1xf32>,
    %c0_i32_23 = arith.constant 0 : i32
    %35 = arith.cmpi eq, %arg1, %c0_i32_23 : i32
    %36 = arith.extui %35 : i1 to i32
    %c0_i32_24 = arith.constant 0 : i32
    %37 = arith.cmpi ne, %36, %c0_i32_24 : i32
    scf.if %37 {
      %c0_25 = arith.constant 0 : index
      %c0_26 = arith.constant 0 : index
      %38 = vector.load %arg9[%c0_25, %c0_26] : memref<8x1xi32, #tpu.memory_space<vmem>>, vector<8x1xi32>
      %c0_27 = arith.constant 0 : index
      %c0_28 = arith.constant 0 : index
      %39 = vector.load %arg6[%c0_27, %c0_28] : memref<8x1xi32, #tpu.memory_space<vmem>>, vector<8x1xi32>
      tpu.vector_store %arg6[%c0_27, %c0_28], %38 {strides = array<i32>} : memref<8x1xi32, #tpu.memory_space<vmem>>, vector<8x1xi32>,
    } else {
    }
    return
  }
  func.func @transform_0(%arg0: i32, %arg1: i32) -> (i32, i32) {
    %c0_i32 = arith.constant 0 : i32
    %c0_i32_0 = arith.constant 0 : i32
    return %arg0, %c0_i32 : i32, i32
  }
  func.func @transform_1(%arg0: i32, %arg1: i32) -> (i32, i32) {
    %c0_i32 = arith.constant 0 : i32
    %c0_i32_0 = arith.constant 0 : i32
    return %c0_i32, %arg1 : i32, i32
  }
  func.func @transform_2(%arg0: i32, %arg1: i32) -> (i32, i32) {
    %c0_i32 = arith.constant 0 : i32
    %c0_i32_0 = arith.constant 0 : i32
    return %c0_i32, %arg1 : i32, i32
  }
  func.func @transform_3(%arg0: i32, %arg1: i32) -> (i32, i32) {
    %c0_i32 = arith.constant 0 : i32
    return %arg0, %arg1 : i32, i32
  }
  func.func @transform_4(%arg0: i32, %arg1: i32) -> (i32, i32) {
    %c0_i32 = arith.constant 0 : i32
    %c0_i32_0 = arith.constant 0 : i32
    return %arg0, %c0_i32 : i32, i32
  }
}

</mosaic_0001>

<bundles_post_ra>
// kernel: tpu_custom_call.1
= control target key start
LH: loop header
LB: loop body
LE: loop exit
PB: predicated region body
PF: predicated region fallthrough
CT: control target
= control target key end

     0   :  { %10 = vsyncpa [#allocation6], 0  ;;  %s1104_s0 = inlined_call_operand.hbm [shape: f32[16,32], index: 0, kind: input, shape index: {}]   ;;  %s1105_s1 = inlined_call_operand.hbm [shape: f32[32,64], index: 1, kind: input, shape index: {}]   ;;  %s1106_s2 = inlined_call_operand.vmem [shape: f32[1,64], index: 2, kind: input, shape index: {}]   ;;  %s1107_s3 = inlined_call_operand.hbm [shape: f32[16,64], index: 3, kind: output, shape index: {0}]   ;;  %s1108_s4 = inlined_call_operand.vmem [shape: s32[16,1], index: 4, kind: output, shape index: {1}]  }
   0x1   :  { %12 = vsyncpa [#allocation6 + $0x1], 0 }
   0x2   :  { %13 = vsyncpa [#allocation9], 0 }
   0x3   :  { %14 = vsyncpa [#allocation7], 0 }
   0x4   :  { %16 = vsyncpa [#allocation7 + $0x1], 0  ;;  %s876_s15 = smov 0   ;;  %s878_s16 = smov 0  }
   0x5   :  { %s880_s17 = smov 0   ;;  %s882_s18 = smov 0  }
   0x6   :  { %s884_s19 = smov 0   ;;  %s886_s20 = smov 0  }
   0x7 LB: > { %s573_s21 = sadd.s32 4294967295, %s839_s20   ;;  %s574_s22 = sadd.s32 4294967294, %s839_s20   ;;  %s839_s20 = sphi %s886_s20, %s22_s20   ;;  %s835_s19 = sphi %s884_s19, %s1132_s19   ;;  %s831_s18 = sphi %s882_s18, %s1131_s18   ;;  %s827_s17 = sphi %s880_s17, %s1130_s17   ;;  %s823_s16 = sphi %s878_s16, %s1129_s16   ;;  %s819_s15 = sphi %s876_s15, %s1128_s15  }
   0x8   : > { %p54_p0 = scmp.ne.s32.totalorder %s823_s16, %s819_s15  ;;  %p910_p1 = scmp.eq.s32.totalorder %s573_s21, 0 }
   0x9   : > { %p914_p2 = scmp.eq.s32.totalorder %s573_s21, 1  ;;  %p138_p3 = scmp.eq.s32.totalorder %s574_s22, 1 }
   0xa   : > { %s1113_s23 = scalar_select %p910_p1, 1, 0 }
   0xb   : > { %s1114_s24 = scalar_select %p914_p2, 1, 0 }
   0xc   : > { %p920_p4 = por %p910_p1, %p54_p0  ;;  %p575_p5 = scmp.ge.s32.totalorder %s839_s20, 1 }
   0xd   : > { %p925_p6 = por %p138_p3, %p54_p0  ;;  %p171_p7 = scmp.lt.s32.totalorder %s839_s20, 3 }
   0xe   : > { %s1115_s25 = scalar_select %p920_p4, 1, 0 }
   0xf   : > { %s1116_s26 = scalar_select %p925_p6, 1, 0 }
  0x10   : > { %p930_p8 = pnand %p575_p5, %p171_p7  ;;  %s841_s28 = smov [#allocation8]  }
  0x11   : > { %s185_s29 = sshll.u32 %s841_s28, 4  ;;  %s34_s5 = sadd.s32 1, %s835_s19  ;;  %s186_s29 = int_to_ptr.vmem [resolvable:$true] %s185_s29 }
  0x12   : > { %s1117_s27 = scalar_select %p930_p8, 1, 0 }
  0x13   : > { %p622_p9 = pneg %p930_p8  ;;  %s695_s8 = scalar_lea.hbm %s1105_s1, 512 }
  0x14   : > { %p696_p12 = scmp.ne.s32.totalorder %s1105_s1, %s695_s8  ;;  %p702_p5 = scmp.lt.u32.totalorder %s695_s8, %s1105_s1 }
  0x15   : > { %p939_p11 = pnand %p622_p9, %p910_p1 }
  0x17   : > { %p697_p13 = pneg %p939_p11 }
  0x19   : > { %p698_p0 = pnand %p697_p13, %p696_p12 }
  0x1b   : > { %p699_p3 = pneg %p698_p0 }
  0x1d   : > { %p704_p7 = pnand %p702_p5, %p699_p3 }
  0x1f   : > { %707 = shalt.err (!%p704_p7)
}
  0x20   : > { %s708_s13 = scalar_lea.vmem %s186_s29, 512  ;;  %p716_p1 = scmp.lt.s32.totalorder %s186_s29, %s186_s29 }
  0x21   : > { %p709_p9 = scmp.ne.s32.totalorder %s186_s29, %s708_s13  ;;  %p717_p4 = scmp.lt.s32.totalorder %s708_s13, %s708_s13 }
  0x23   : > { %p711_p10 = pnand %p709_p9, %p697_p13  ;;  %p718_p8 = por %p717_p4, %p716_p1 }
  0x25   : > { %p712_p6 = pneg %p711_p10 }
  0x27   : > { %p719_p2 = pnand %p718_p8, %p712_p6 }
  0x29   : > { %722 = shalt.err (!%p719_p2)
}
  0x2a   : > { %s842_s14 = smov 128   ;;  %s843_s21 = smov 8  }
  0x2b   : > { %625 = dma.hbm_to_vmem [thread:$0]  (!%p939_p11), %s1105_s1, 512, %s186_s29, [#allocation9], %s842_s14, %s842_s14, %s843_s21  }
  0x2c   : > { %p36_p1 = scmp.ge.s32.totalorder %s34_s5, 2  ;;  %s41_s6 = sadd.s32 1, %s827_s17 }
  0x2d   : > { %p48_p2 = scmp.ne.s32.totalorder %s827_s17, %s823_s16  ;;  %p49_p4 = scmp.eq.s32.totalorder %s839_s20, 0 }
  0x2e   : > { %s1134_s5 = smov (%p36_p1, %s34_s5), 0  ;;  %p1120_p8 = scmp.ne.s32.totalorder %s1114_s24, 0 }
  0x2f   : > { %p966_p6 = por %p49_p4, %p48_p2  ;;  %s38_s30 = ssub.s32 %s835_s19, %s1134_s5 }
  0x30   : > { %p972_p10 = por %p1120_p8, %p48_p2  ;;  %p635_p12 = scmp.lt.s32.totalorder %s839_s20, 2 }
  0x31   : > { %p39_p11 = scmp.eq.s32.totalorder %s38_s30, 0  ;;  %s205_s29 = sand.u32 1, %s827_s17  }
  0x32   : > { %s579_s9 = sshll.u32 %s205_s29, 3  ;;  %s580_s11 = sshll.u32 %s835_s19, 7 }
  0x33   : > { %s981_s10 = scalar_select %p39_p11, %s827_s17, %s41_s6  }
  0x34   : > { %s987_s14 = scalar_lea.hbm %s1104_s0, %s580_s11  ;;  %s209_s24 = scalar_lea.vmem [#allocation5], %s579_s9 }
  0x35   : > { %s216_s21 = sshll.u32 %s209_s24, 4  ;;  %p993_p13 = pnand %p635_p12, %p966_p6  ;;  %s989_s21 = int_to_ptr.vmem [resolvable:$true] %s216_s21 }
  0x36   : > { %s206_s28 = scalar_lea.sflag [#allocation6], %s205_s29  ;;  %s723_s6 = scalar_lea.hbm %s987_s14, 128 }
  0x37   : > { %p724_p0 = scmp.ne.s32.totalorder %s987_s14, %s723_s6  ;;  %p725_p3 = pneg %p993_p13 }
  0x38   : > { %s728_s11 = scalar_lea.hbm %s1104_s0, 256  ;;  %p729_p9 = scmp.lt.u32.totalorder %s987_s14, %s1104_s0 }
  0x39   : > { %p726_p5 = pnand %p725_p3, %p724_p0  ;;  %p730_p1 = scmp.lt.u32.totalorder %s728_s11, %s723_s6 }
  0x3a   : > { %p732_p4 = scmp.lt.u32.totalorder %s723_s6, %s987_s14 }
  0x3b   : > { %p727_p7 = pneg %p726_p5  ;;  %p731_p2 = por %p730_p1, %p729_p9 }
  0x3d   : > { %p733_p6 = por %p732_p4, %p731_p2 }
  0x3f   : > { %p734_p8 = pnand %p733_p6, %p727_p7 }
  0x41   : > { %737 = shalt.err (!%p734_p8)
}
  0x42   : > { %s738_s29 = scalar_lea.vmem %s989_s21, 128  ;;  %s844_s13 = smov [#allocation5]  }
  0x43   : > { %p739_p12 = scmp.ne.s32.totalorder %s989_s21, %s738_s29  ;;  %s743_s24 = sshll.u32 %s844_s13, 4  ;;  %s744_s24 = int_to_ptr.vmem [resolvable:$false] %s743_s24 }
  0x44   : > { %s745_s30 = scalar_lea.vmem %s744_s24, 256  ;;  %p746_p5 = scmp.lt.s32.totalorder %s989_s21, %s744_s24 }
  0x45   : > { %p741_p11 = pnand %p739_p12, %p725_p3  ;;  %p747_p9 = scmp.lt.s32.totalorder %s745_s30, %s738_s29 }
  0x47   : > { %p742_p0 = pneg %p741_p11  ;;  %p748_p1 = por %p747_p9, %p746_p5 }
  0x49   : > { %p749_p2 = pnand %p748_p1, %p742_p0 }
  0x4b   : > { %752 = shalt.err (!%p749_p2)
}
  0x4c   : > { %629 = dma.hbm_to_vmem [thread:$0]  (!%p993_p13), %s987_s14, 128, %s989_s21, %s206_s28  }
  0x4d   : > { %p1123_p7 = scmp.ne.s32.totalorder %s1117_s27, 0 }
  0x4e   : > { %s1025_s6 = sand.u32 (!%p1123_p7), 1, %s823_s16   ;;  %p1124_p3 = scmp.ne.s32.totalorder (!%p1123_p7), %s1115_s25, 0 }
  0x4f   : > { %225 = sbr.rel (%p1123_p7) target bundleno = 827 (0x33b), region = 32  ;;  %s582_s9 = sshll.u32 (!%p1123_p7), %s1025_s6, 3 }
  0x50   : > { %s228_s11 = scalar_lea.sflag (!%p1123_p7), [#allocation6], %s1025_s6  ;;  %s231_s7 = scalar_lea.vmem (!%p1123_p7), [#allocation5], %s582_s9 }
  0x56   : > { %806 = dma.done.wait (%p1124_p3), %s228_s11, 128  }
  0x57   : > { %808 = vsyncadd (%p1124_p3), %s228_s11, 4294967168  ;;  %p1125_p13 = scmp.ne.s32.totalorder %s1113_s23, 0 }
  0x59   : > { %810 = dma.done.wait (%p1125_p13), [#allocation9], 512  }
  0x5a   : > { %812 = vsyncadd (%p1125_p13), [#allocation9], 4294966784  ;;  %v845_v0 = vmov 0.0|0.0   ;;  %vm846_vm0 = vmmov 0   ;;  %v847_v1 = vmov 0.0   ;;  %vm284_vm1 = vcmask 7168  }
  0x5b   : > { %608 = vmatprep.subr.bf16.mxu0 %v845_v0  ;;  %605 = vmatprep.mubr.msk.f32.mxu0 %vm846_vm0, %v847_v1  ;;  %v848_v2 = vmov inf   ;;  %v278_v3 = vld [vmem:[%s231_s7] sm:$0xff]  ;;  %vm280_vm2 = vcmask 261120   ;;  %v289_v4 = vld [vmem:[#allocation8] sm:$0xff]  ;;  %v290_v5 = vld [vmem:[#allocation8 + $0x8] sm:$0xff]  ;;  %v849_v12 = vmov 0   ;;  %v388_v23 = vlaneseq }
  0x5c   : > { %286 = vst.msk [vmem:[#allocation3] sm:$0xff] %vm284_vm1, %v848_v2  ;;  %v279_v6 = vmul.f32 %v278_v3, %v278_v3  ;;  %v609_v7 = vpack.c.bf16 %v290_v5, %v289_v4  ;;  %v291_v8 = vld [vmem:[#allocation8 + $0x10] sm:$0xff]  ;;  %v292_v9 = vld [vmem:[#allocation8 + $0x18] sm:$0xff]  ;;  %694 = vset.pattern.permute.xlu0 %v849_v12  ;;  %287 = vst.msk [vmem:[#allocation4] sm:$0xff] %vm284_vm1, %v849_v12  ;;  %vm383_vm3 = vcmask 523264   ;;  %s260_s27 = scalar_lea.vmem [#allocation10], %s582_s9 }
  0x5d   : > { %v612_v11 = vpack.c.bf16 %v292_v9, %v291_v8  ;;  %v587_v17 = vld [vmem:[%s1106_s2] ss:$0 sm:$0xff]  ;;  %v389_v25 = vand.u32 127, %v388_v23  ;;  %s589_s14 = sshll.u32 %s831_s18, 7  ;;  %s443_s21 = sshll.u32 %s260_s27, 4  ;;  %s444_s21 = int_to_ptr.vmem [resolvable:$true] %s443_s21 }
  0x5e   : > { %v281_v10 = vsel %vm280_vm2, %v279_v6, 0.0  ;;  %610 = vmatpush3.bf16.msra.mxu0 %v609_v7  ;;  %s1053_s12 = scalar_lea.hbm %s1107_s3, %s589_s14  ;;  %s425_s29 = scalar_lea.sflag [#allocation7], %s1025_s6 }
  0x5f   : > { %282 = vadd.xlane.f32.xlu0 %v281_v10  ;;  %611 = vmatprep.subr.bf16.mxu0 %v845_v0  ;;  %s753_s13 = scalar_lea.vmem %s444_s21, 128  ;;  %s850_s24 = smov [#allocation10]  }
  0x60   : > { %p754_p4 = scmp.ne.s32.totalorder %s444_s21, %s753_s13  ;;  %s757_s30 = sshll.u32 %s850_s24, 4  ;;  %s758_s30 = int_to_ptr.vmem [resolvable:$false] %s757_s30 }
  0x61   : > { %s759_s9 = scalar_lea.vmem %s758_s30, 256  ;;  %p760_p12 = scmp.lt.s32.totalorder %s444_s21, %s758_s30 }
  0x62   : > { %613 = vmatpush3.bf16.msra.mxu0 %v612_v11  ;;  %p755_p6 = pnand %p754_p4, %p972_p10  ;;  %p761_p11 = scmp.lt.s32.totalorder %s759_s9, %s753_s13 }
  0x63   : > { %v410_v24 = vld [vmem:[#allocation3] sm:$0xff] }
  0x64   : > { %p756_p8 = pneg %p755_p6  ;;  %p762_p0 = por %p761_p11, %p760_p12 }
  0x65   : > { %606 = vmatmul.mubr.msk.f32.vlgmr.msra.gmra.mrb[0].mxu0 %vm280_vm2, %v278_v3 }
  0x66   : > { %p763_p5 = pnand %p762_p0, %p756_p8 }
  0xec   : > { %v283_v13 = vpop.xlane.xlu0 %282 }
  0xed   : > { %285 = vst.msk [vmem:[#allocation2] sm:$0xff] %vm284_vm1, %v283_v13 }
  0xf4   : > { %v367_v14 = vld [vmem:[#allocation2] sm:$0xff] }
  0xf5   : > { %371 = vperm.xlu0 %694, %v367_v14  }
 0x138   : > { %v363_v15 = vpop.f32.mrb[0].mxu0 }
 0x139   : > { %v607_v16 = vpop.f32.mrb[1].mxu0  ;;  %v381_v18 = vmul.f32 2.0, %v363_v15 }
 0x174   : > { %v372_v19 = vpop.permute.xlu0 %371 }
 0x175   : > { %v380_v20 = vadd.f32 %v587_v17, %v372_v19 }
 0x177   : > { %v382_v21 = vsub.f32 %v380_v20, %v381_v18 }
 0x179   : > { %v385_v22 = vsel %vm383_vm3, %v382_v21, inf  ;;  %384 = vst.msk [vmem:[%s260_s27] sm:$0xff] %vm383_vm3, %v382_v21 }
 0x17a   : > { %386 = vmin.xlane.f32.xlu1 %v385_v22 }
 0x207   : > { %v387_v26 = vpop.xlane.xlu1 %386 }
 0x208   : > { %vm390_vm4 = vcmp.eq.f32.partialorder %v382_v21, %v387_v26  ;;  %vm411_vm5 = vcmp.lt.f32.partialorder %v387_v26, %v410_v24 }
 0x209   : > { %v417_v27 = vsel %vm411_vm5, %v387_v26, %v410_v24  ;;  %v391_v28 = vsel %vm390_vm4, %v389_v25, 1073741824 }
 0x20a   : > { %418 = vst.msk [vmem:[#allocation3] sm:$0xff] %vm284_vm1, %v417_v27  ;;  %v392_v29 = vsel %vm383_vm3, %v391_v28, 2147483647 }
 0x20b   : > { %v394_v30 = vshra.s32 %v392_v29, 16  ;;  %v393_v32 = vand.u32 65535, %v392_v29 }
 0x20d   : > { %v396_v31 = vcvt.s32.f32 %v394_v30  ;;  %v395_v34 = vcvt.s32.f32 %v393_v32 }
 0x20f   : > { %397 = vmin.xlane.f32.xlu1 %v396_v31 }
 0x29c   : > { %v398_v33 = vpop.xlane.xlu1 %397 }
 0x29d   : > { %vm399_vm6 = vcmp.eq.f32.partialorder %v396_v31, %v398_v33 }
 0x29e   : > { %v400_v35 = vsel %vm399_vm6, %v395_v34, inf }
 0x29f   : > { %401 = vmin.xlane.f32.xlu1 %v400_v35 }
 0x2a0   : > { %766 = shalt.err (!%p763_p5)
}
 0x2a1   : > { %s767_s6 = scalar_lea.hbm %s1053_s12, 128  ;;  %s771_s23 = scalar_lea.hbm %s1107_s3, 256 }
 0x2a2   : > { %p768_p9 = scmp.ne.s32.totalorder %s1053_s12, %s767_s6  ;;  %p772_p7 = scmp.lt.u32.totalorder %s1053_s12, %s1107_s3 }
 0x2a3   : > { %p773_p3 = scmp.lt.u32.totalorder %s771_s23, %s767_s6  ;;  %p775_p4 = scmp.lt.u32.totalorder %s767_s6, %s1053_s12 }
 0x2a4   : > { %p769_p1 = pnand %p768_p9, %p972_p10 }
 0x2a5   : > { %p774_p13 = por %p773_p3, %p772_p7 }
 0x2a6   : > { %p770_p2 = pneg %p769_p1 }
 0x2a7   : > { %p776_p6 = por %p775_p4, %p774_p13 }
 0x2a9   : > { %p777_p8 = pnand %p776_p6, %p770_p2 }
 0x2ab   : > { %780 = shalt.err (!%p777_p8)
}
 0x2ac   : > { %620 = dma.vmem_to_hbm [thread:$0]  (%p972_p10), %s444_s21, 128, %s1053_s12, %s425_s29   ;;  %v404_v36 = vcvt.f32.s32 %v398_v33  ;;  %v412_v40 = vld [vmem:[#allocation4] sm:$0xff] }
 0x2ad   : > { %p270_p12 = scmp.lt.s32.totalorder %s831_s18, 1 }
 0x2ae   : > { %v405_v38 = vshll.u32 %v404_v36, 16 }
 0x2af   : > { %s1136_s18 = smov (!%p270_p12, %s831_s18), 1 }
 0x2b0   : > { %s585_s14 = sshll.u32 %s1136_s18, 3 }
 0x2b1   : > { %s273_s8 = scalar_lea.vmem %s1108_s4, %s585_s14 }
 0x32c   : > { %v402_v37 = vpop.xlane.xlu1 %401 }
 0x32d   : > { %v403_v39 = vcvt.f32.s32 %v402_v37 }
 0x32f   : > { %v406_v41 = vadd.s32 %v405_v38, %v403_v39 }
 0x331   : > { %v413_v42 = vsel %vm411_vm5, %v406_v41, %v412_v40 }
 0x332   : > { %415 = vst.msk [vmem:[#allocation4] sm:$0xff] %vm284_vm1, %v413_v42 }
 0x339   : > { %v422_v43 = vld [vmem:[#allocation4] sm:$0xff] }
 0x33a   : > { %423 = vst.msk [vmem:[%s273_s8] sm:$0xff] %vm284_vm1, %v422_v43 }
 0x33b PF: > { %s458_s21 = sand.u32 1, %s819_s15   ;;  %p1126_p10 = scmp.ne.s32.totalorder %s1116_s26, 0 }
 0x33c   : > { %p1127_p11 = scmp.ge.s32.totalorder %s839_s20, 2  ;;  %s459_s12 = scalar_lea.sflag [#allocation7], %s458_s21 }
 0x33e   : > { %p631_p0 = pnand %p1127_p11, %p1126_p10 }
 0x340   : > { %814 = dma.done.wait (!%p631_p0), %s459_s12, 128  }
 0x341   : > { %816 = vsyncadd (!%p631_p0), %s459_s12, 4294967168  ;;  %s22_s20 = sadd.s32 1, %s839_s20   ;;  %s1128_s15 = smov %s823_s16 }
 0x342   : > { %p19_p5 = scmp.ge.s32.totalorder %s22_s20, 4   ;;  %s1129_s16 = smov %s827_s17 }
 0x343   : > { %s1130_s17 = smov %s981_s10  ;;  %s1131_s18 = smov %s835_s19 }
 0x344   : > { %s1132_s19 = smov %s1134_s5  ;;  %21 = sbr.rel (!%p19_p5) target bundleno = 7 (0x7), region = 105 }
 0x34b   :  { %471 = vsyncpa [#allocation6], 1 }
 0x34c   :  { %473 = vsyncpa [#allocation6 + $0x1], 1 }
 0x34d   :  { %474 = vsyncpa [#allocation9], 1 }
 0x34e   :  { %475 = vsyncpa [#allocation7], 1 }
 0x34f   :  { %477 = vsyncpa [#allocation7 + $0x1], 1 }

</bundles_post_ra>
